<compile_context>
chip_gen: v5e
topology: v5e:2x2
jax: 0.10.0
libtpu: 0.0.40
codegen_flags: <defaults>
</compile_context>

<pallas_src>
import jax
import jax.numpy as jnp
from jax.experimental import pallas as pl
from jax.experimental.pallas import tpu as pltpu

_LANE = 128
_LANE_CANDIDATES = (1024, 512, 256, 128)   # widest lane-dense slab that divides the size
_TARGET_BLOCK_BYTES = 2 * 1024 * 1024      # ~2 MiB/block: roofline plateau, fits all gens
_SMALL_INPUT_BYTES = 256 * 1024            # below this, pallas_call overhead dwarfs the work


def _scale_kernel(x_ref, scale_ref, o_ref):
    # One SMEM scalar load per grid step; pure elementwise multiply on the VPU.
    # Compute in f32 so integer / bf16 inputs don't truncate or lose precision.
    s = scale_ref[0]
    o_ref[...] = (x_ref[...].astype(jnp.float32) * s).astype(o_ref.dtype)


def scale_forward(x, scale, *, force_pallas=False,
                  target_block_bytes=_TARGET_BLOCK_BYTES, donate_input=False):
    """Apply x * scale with a Pallas TPU kernel (any shape / dtype)."""
    # Output dtype follows JAX's `tensor * python_scalar` promotion (matches the
    # fast path below and PyTorch's behavior for float tensors).
    out_dtype = jax.eval_shape(lambda a: a * scale,
                               jax.ShapeDtypeStruct((), x.dtype)).dtype
    n_elems = x.size

    # Small-input fast path: XLA fuses this for free; kernel overhead would dominate.
    if n_elems == 0 or (not force_pallas and
                        n_elems * jnp.dtype(x.dtype).itemsize < _SMALL_INPUT_BYTES):
        return x * scale

    orig_shape = x.shape
    flat = jnp.reshape(x, (-1,))

    # Widest lane width that divides the size -> no pad / no extra HBM copy.
    lane = next((w for w in _LANE_CANDIDATES if n_elems % w == 0), None)
    padded = lane is None
    if padded:
        lane = _LANE
        flat = jnp.pad(flat, (0, (-n_elems) % lane))   # rare fallback, single fused pad
    rows = flat.size // lane
    x2d = jnp.reshape(flat, (rows, lane))

    in_itemsize = jnp.dtype(x.dtype).itemsize
    out_itemsize = jnp.dtype(out_dtype).itemsize
    # Sublane granularity of the narrower dtype: 8 (32-bit), 16 (16-bit), 32 (8-bit).
    sub = max(8, 32 // min(in_itemsize, out_itemsize))
    max_itemsize = max(in_itemsize, out_itemsize)
    target_rows = max(sub, (target_block_bytes // (lane * max_itemsize)) // sub * sub)

    if rows <= target_rows:
        tile_rows = rows            # single block == full array dims (always legal)
    else:
        tile_rows = target_rows     # sublane-aligned; ragged last block is masked by Pallas
    grid = pl.cdiv(rows, tile_rows)

    scale_arr = jnp.reshape(jnp.asarray(scale, dtype=jnp.float32), (1,))

    aliases = {}
    if donate_input and not padded and jnp.dtype(x.dtype) == jnp.dtype(out_dtype):
        aliases = {0: 0}            # stream the result back into x's HBM pages

    out2d = pl.pallas_call(
        _scale_kernel,
        out_shape=jax.ShapeDtypeStruct((rows, lane), out_dtype),
        grid=(grid,),
        in_specs=[
            pl.BlockSpec((tile_rows, lane), lambda i: (i, 0)),
            pl.BlockSpec(memory_space=pltpu.MemorySpace.SMEM),   # runtime scalar `scale`
        ],
        out_specs=pl.BlockSpec((tile_rows, lane), lambda i: (i, 0)),
        input_output_aliases=aliases,
        compiler_params=pltpu.CompilerParams(
            dimension_semantics=("parallel",)),   # lets v7x split the grid across its 2 TCs
    )(x2d, scale_arr)

    if padded:
        return jnp.reshape(jnp.reshape(out2d, (-1,))[:n_elems], orig_shape)
    return jnp.reshape(out2d, orig_shape)


if __name__ == "__main__":
    key = jax.random.PRNGKey(0)
    scale = 1.0 / 255.0

    # PPO-Atari style Scale(1/255) on a small NCHW tensor: batch=2, channels=4, 16x16.
    x = jax.random.uniform(key, (2, 4, 16, 16), dtype=jnp.float32) * 255.0
    ref = x * scale

    # 1) Force the Pallas kernel even though this demo tensor is tiny.
    out = jax.block_until_ready(scale_forward(x, scale, force_pallas=True))
    assert out.shape == x.shape and out.dtype == ref.dtype
    assert jnp.allclose(out, ref, atol=1e-6), "pallas path mismatch vs reference"

    # 2) Default path for a tiny tensor -> plain-JAX fast path.
    out_fast = jax.block_until_ready(scale_forward(x, scale))
    assert jnp.allclose(out_fast, ref, atol=1e-6), "fast path mismatch vs reference"

    # 3) Exercise the multi-block grid + padded ragged-tail path at small size
    #    by shrinking the per-block target (size not divisible by 128).
    x2 = jax.random.uniform(jax.random.PRNGKey(0), (2, 4, 17, 19), dtype=jnp.float32)
    out2 = jax.block_until_ready(
        scale_forward(x2, scale, force_pallas=True, target_block_bytes=4096))
    assert out2.shape == x2.shape
    assert jnp.allclose(out2, x2 * scale, atol=1e-6), "multi-block path mismatch"

    print("KERNEL_OK")
</pallas_src>

<mosaic_0001>
module attributes {stable_mosaic.version = 11 : i64} {
  func.func @_scale_kernel(%arg0: i32, %arg1: memref<2x1024xf32, #tpu.memory_space<vmem>>, %arg2: memref<1xf32, #tpu.memory_space<smem>>, %arg3: memref<2x1024xf32, #tpu.memory_space<vmem>>) attributes {dimension_semantics = [#tpu.dimension_semantics<parallel>], iteration_bounds = array<i64: 1>, scalar_prefetch = 0 : i64, scratch_operands = 0 : i64, tpu.core_type = #tpu.core_type<tc>, window_params = [{transform_indices = @transform_0, window_bounds = array<i64: 2, 1024>}, {transform_indices = @transform_1, window_bounds = array<i64: 1>}, {transform_indices = @transform_2, window_bounds = array<i64: 2, 1024>}]} {
    %c0 = arith.constant 0 : index
    %0 = memref.load %arg2[%c0] : memref<1xf32, #tpu.memory_space<smem>>
    %c0_0 = arith.constant 0 : index
    %c0_1 = arith.constant 0 : index
    %1 = vector.load %arg1[%c0_0, %c0_1] : memref<2x1024xf32, #tpu.memory_space<vmem>>, vector<2x1024xf32>
    %2 = vector.broadcast %0 : f32 to vector<2x1024xf32>
    %3 = arith.mulf %1, %2 : vector<2x1024xf32>
    %c0_2 = arith.constant 0 : index
    %c0_3 = arith.constant 0 : index
    %4 = vector.load %arg3[%c0_2, %c0_3] : memref<2x1024xf32, #tpu.memory_space<vmem>>, vector<2x1024xf32>
    tpu.vector_store %arg3[%c0_2, %c0_3], %3 {strides = array<i32>} : memref<2x1024xf32, #tpu.memory_space<vmem>>, vector<2x1024xf32>,
    return
  }
  func.func @transform_0(%arg0: i32) -> (i32, i32) {
    %c0_i32 = arith.constant 0 : i32
    %c0_i32_0 = arith.constant 0 : i32
    return %arg0, %c0_i32 : i32, i32
  }
  func.func @transform_1(%arg0: i32) -> i32 {
    %c0_i32 = arith.constant 0 : i32
    %c0_i32_0 = arith.constant 0 : i32
    return %c0_i32 : i32
  }
  func.func @transform_2(%arg0: i32) -> (i32, i32) {
    %c0_i32 = arith.constant 0 : i32
    %c0_i32_0 = arith.constant 0 : i32
    return %arg0, %c0_i32 : i32, i32
  }
}

</mosaic_0001>

<bundles_post_ra>
// kernel: tpu_custom_call.1
= control target key start
LH: loop header
LB: loop body
LE: loop exit
PB: predicated region body
PF: predicated region fallthrough
CT: control target
= control target key end

     0   :  { %8 = vsyncpa [#allocation4], 0  ;;  %s132_s0 = inlined_call_operand.hbm [shape: f32[2,1024], index: 0, kind: input, shape index: {}]   ;;  %s133_s1 = inlined_call_operand.<no memory space> [shape: f32[1], index: 1, kind: input, shape index: {}]   ;;  %s134_s2 = inlined_call_operand.hbm [shape: f32[2,1024], index: 2, kind: output, shape index: {}]  }
   0x1   :  { %9 = vsyncpa [#allocation5], 0  ;;  %s15_s11 = sshll.u32 %s132_s0, 4  ;;  %s106_s12 = smov [#allocation3]   ;;  %s16_s11 = int_to_ptr.hbm [resolvable:$true] %s15_s11 }
   0x2   :  { %s17_s13 = sshll.u32 %s106_s12, 4  ;;  %s18_s13 = int_to_ptr.vmem [resolvable:$true] %s17_s13 }
   0x3   :  { %20 = dma.hbm_to_vmem [thread:$0]  %s16_s11, 256, %s18_s13, [#allocation4]  }
   0x4   :  { %102 = dma.done.wait [#allocation4], 256  }
   0x5   :  { %103 = vsyncadd [#allocation4], 4294967040  ;;  %v30_v0 = vstv %s133_s1  ;;  %s107_s16 = smov [#allocation6]   ;;  %s42_s20 = sshll.u32 %s134_s2, 4  ;;  %v28_v1 = vld [vmem:[#allocation3] sm:$0xff]  ;;  %v29_v2 = vld [vmem:[#allocation3 + $0x8] sm:$0xff]  ;;  %s43_s20 = int_to_ptr.hbm [resolvable:$true] %s42_s20 }
   0x6   :  { %s40_s17 = sshll.u32 %s107_s16, 4  ;;  %v31_v3 = vmul.f32 %v30_v0, %v28_v1  ;;  %v32_v4 = vmul.f32 %v30_v0, %v29_v2  ;;  %s41_s17 = int_to_ptr.vmem [resolvable:$true] %s40_s17 }
   0x8   :  { %33 = vst [vmem:[#allocation6] sm:$0xff] %v31_v3 }
   0x9   :  { %34 = vst [vmem:[#allocation6 + $0x8] sm:$0xff] %v32_v4 }
   0xa   :  { %45 = dma.vmem_to_hbm [thread:$0]  %s41_s17, 256, %s43_s20, [#allocation5]  }
   0xb   :  { %104 = dma.done.wait [#allocation5], 256  }
   0xc   :  { %105 = vsyncadd [#allocation5], 4294967040 }
   0xd   :  { %50 = vsyncpa [#allocation4], 1 }
   0xe   :  { %51 = vsyncpa [#allocation5], 1 }

</bundles_post_ra>
